<compile_context>
chip_gen: v7x
topology: tpu7x:2x2x1
jax: 0.10.0
libtpu: 0.0.40
codegen_flags: <defaults>
</compile_context>

<pallas_src>
import math
import functools

import jax
import jax.numpy as jnp
from jax import lax
from jax.experimental import pallas as pl
from jax.experimental.pallas import tpu as pltpu


_INV_SQRT2 = 1.0 / math.sqrt(2.0)
_MiB = 1024 * 1024


def _round_up(n, m):
    return ((n + m - 1) // m) * m


def _cdiv(a, b):
    return -(-a // b)


def _pad2_bytes(r, c, itemsize):
    """Bytes of an (r, c) VMEM buffer after (8, 128) tile padding."""
    return _round_up(max(int(r), 1), 8) * _round_up(max(int(c), 1), 128) * int(itemsize)


def _gelu(h, approx):
    if approx:
        # tanh formulation -> EUP slot (frees VALU); slight numeric difference.
        return jax.nn.gelu(h, approximate=True)
    # erf formulation: matches the PyTorch module exactly.
    return h * 0.5 * (1.0 + lax.erf(h * _INV_SQRT2))


def _layernorm(z, gamma, beta, eps):
    u = jnp.mean(z, axis=-1, keepdims=True)
    d = z - u
    s = jnp.mean(d * d, axis=-1, keepdims=True)
    return gamma * (d * lax.rsqrt(s + eps)) + beta


# --------------------------------------------------------------------------
# Fast path: full W1/W2 resident in VMEM, single-pass per row tile.
# --------------------------------------------------------------------------
def _resident_kernel(x_ref, w1_ref, b1_ref, w2_ref, b2_ref, g_ref, be_ref,
                     o_ref, *, eps, approx_gelu):
    x = x_ref[...].astype(jnp.float32)               # (tm, D) f32 (residual)
    mm_dtype = w1_ref.dtype                          # f32 or bf16 matmul inputs

    h = jnp.dot(x.astype(mm_dtype), w1_ref[...],
                preferred_element_type=jnp.float32) + b1_ref[...]
    h = _gelu(h, approx_gelu)
    y = jnp.dot(h.astype(mm_dtype), w2_ref[...],
                preferred_element_type=jnp.float32) + b2_ref[...]

    # dropout: eval mode -> identity
    # TODO(synk): training-mode dropout would need pltpu.prng_* masking.
    z = y + x
    o_ref[...] = _layernorm(z, g_ref[...], be_ref[...], eps).astype(o_ref.dtype)


# --------------------------------------------------------------------------
# Fallback: H (intermediate) dimension streamed in chunks (reduction axis).
# --------------------------------------------------------------------------
def _chunked_kernel(x_ref, w1_ref, b1_ref, w2_ref, b2_ref, g_ref, be_ref,
                    o_ref, *scratch, eps, approx_gelu, cast_x, acc_in_out):
    idx = 0
    if acc_in_out:
        acc_ref = o_ref                              # f32 output doubles as acc
    else:
        acc_ref = scratch[idx]
        idx += 1
    xmm_ref = scratch[idx] if cast_x else None

    j = pl.program_id(1)
    nh = pl.num_programs(1)
    mm_dtype = w1_ref.dtype

    if cast_x:
        # Hoisted cast: x is j-invariant; cast once per row tile, not per chunk.
        @pl.when(j == 0)
        def _():
            xmm_ref[...] = x_ref[...].astype(mm_dtype)
        x_mm = xmm_ref[...]
    else:
        x_mm = x_ref[...]

    h = jnp.dot(x_mm, w1_ref[...],
                preferred_element_type=jnp.float32) + b1_ref[...]
    h = _gelu(h, approx_gelu)
    contrib = jnp.dot(h.astype(mm_dtype), w2_ref[...],
                      preferred_element_type=jnp.float32)

    @pl.when(j == 0)
    def _():
        acc_ref[...] = contrib.astype(acc_ref.dtype)   # no zero-fill + add

    @pl.when(j > 0)
    def _():
        acc_ref[...] = (acc_ref[...].astype(jnp.float32)
                        + contrib).astype(acc_ref.dtype)

    @pl.when(j == nh - 1)
    def _():
        x = x_ref[...].astype(jnp.float32)
        # dropout: eval mode -> identity
        z = acc_ref[...].astype(jnp.float32) + b2_ref[...] + x
        o_ref[...] = _layernorm(z, g_ref[...], be_ref[...], eps).astype(o_ref.dtype)


# --------------------------------------------------------------------------
# Wrapper
# --------------------------------------------------------------------------
def intermediate_forward(x, w1, b1, w2, b2, gamma, beta, *, eps=1e-12,
                         row_tile=None, h_tile=None,
                         matmul_dtype=jnp.bfloat16, approx_gelu=False):
    """x: [B, S, D]. w1 (D,4D), b1 (4D,), w2 (4D,D), b2 (D,), gamma (D,),
    beta (D,). Returns [B, S, D].

    matmul_dtype: bf16 (default, MXU-native, f32 accumulation) or f32 for the
    verification path.  h_tile forces the chunked (streamed-weight) path."""
    B, S, D = x.shape
    H = w1.shape[1]
    rows = B * S
    out_dtype = x.dtype
    out_itemsize = jnp.dtype(out_dtype).itemsize

    mm_dtype = jnp.dtype(matmul_dtype)
    mmb = mm_dtype.itemsize
    cast_x = (mm_dtype != jnp.dtype(jnp.float32))
    acc_in_out = (jnp.dtype(out_dtype) == jnp.dtype(jnp.float32))

    x2 = x.reshape(rows, D).astype(jnp.float32)
    w1c = w1.astype(mm_dtype)
    w2c = w2.astype(mm_dtype)
    b1_2 = b1.reshape(1, H).astype(jnp.float32)
    b2_2 = b2.reshape(1, D).astype(jnp.float32)
    g_2 = gamma.reshape(1, D).astype(jnp.float32)
    be_2 = beta.reshape(1, D).astype(jnp.float32)

    # Per-TensorCore VMEM capacity; conservative fallback (64 MiB) covers v7x.
    try:
        vmem_cap = int(pltpu.get_tpu_info().vmem_capacity_bytes)
    except Exception:
        vmem_cap = 64 * _MiB
    budget = int(vmem_cap * 0.8)

    rows8 = _round_up(rows, 8)

    def resident_bytes(tm):
        return (2 * _pad2_bytes(tm, D, 4)                                   # x blocks
                + 2 * _pad2_bytes(tm, D, out_itemsize)                      # out blocks
                + 2 * (_pad2_bytes(D, H, mmb) + _pad2_bytes(H, D, mmb))     # W1/W2
                + 2 * (_pad2_bytes(1, H, 4) + 3 * _pad2_bytes(1, D, 4))     # biases
                + _pad2_bytes(tm, H, 4) + _pad2_bytes(tm, H, mmb)           # h temporaries
                + 4 * _pad2_bytes(tm, D, 4))                                # LN temporaries

    def chunked_bytes(tm, th):
        bts = (2 * _pad2_bytes(tm, D, 4)
               + 2 * _pad2_bytes(tm, D, out_itemsize)
               + 2 * (_pad2_bytes(D, th, mmb) + _pad2_bytes(th, D, mmb))
               + 2 * (_pad2_bytes(1, th, 4) + 3 * _pad2_bytes(1, D, 4))
               + _pad2_bytes(tm, th, 4) + _pad2_bytes(tm, th, mmb)
               + 4 * _pad2_bytes(tm, D, 4))
        if not acc_in_out:
            bts += _pad2_bytes(tm, D, 4)       # separate f32 accumulator
        if cast_x:
            bts += _pad2_bytes(tm, D, mmb)     # hoisted bf16 x copy
        return bts

    def pick_tm(cost_fn, want):
        tm = max(8, min(_round_up(int(want), 8), rows8))
        while tm > 8 and cost_fn(tm) > budget:
            tm -= 8
        # v7x has 2 TensorCores: prefer an even number of row tiles when > 1.
        n = _cdiv(rows, tm)
        if n > 1 and n % 2 == 1:
            tm2 = max(8, _round_up(_cdiv(rows, n + 1), 8))
            if tm2 <= tm and _cdiv(rows, tm2) % 2 == 0:
                tm = tm2
        return tm

    use_resident = (h_tile is None) and (resident_bytes(8) <= budget)

    if use_resident:
        tm = pick_tm(resident_bytes, row_tile if row_tile is not None else 512)
        grid = (_cdiv(rows, tm),)
        est = resident_bytes(tm)
        kernel = functools.partial(_resident_kernel, eps=eps,
                                   approx_gelu=approx_gelu)
        grid_spec = pltpu.PrefetchScalarGridSpec(
            num_scalar_prefetch=0,
            grid=grid,
            in_specs=[
                pl.BlockSpec((tm, D), lambda i: (i, 0)),   # x rows
                pl.BlockSpec((D, H), lambda i: (0, 0)),    # W1 (resident)
                pl.BlockSpec((1, H), lambda i: (0, 0)),    # b1
                pl.BlockSpec((H, D), lambda i: (0, 0)),    # W2 (resident)
                pl.BlockSpec((1, D), lambda i: (0, 0)),    # b2
                pl.BlockSpec((1, D), lambda i: (0, 0)),    # gamma
                pl.BlockSpec((1, D), lambda i: (0, 0)),    # beta
            ],
            out_specs=pl.BlockSpec((tm, D), lambda i: (i, 0)),
            scratch_shapes=[],
        )
        dims = ("parallel",)
    else:
        # Pad H with zeros to a multiple of 128 if needed (zero columns of W1 /
        # zero rows of W2 contribute exactly zero to the accumulation).
        Hp = H
        if H % 128 != 0:
            Hp = _round_up(H, 128)
            w1c = jnp.pad(w1c, ((0, 0), (0, Hp - H)))
            b1_2 = jnp.pad(b1_2, ((0, 0), (0, Hp - H)))
            w2c = jnp.pad(w2c, ((0, Hp - H), (0, 0)))

        if h_tile is not None:
            th = min(int(h_tile), Hp)
            assert th % 128 == 0 and Hp % th == 0, \
                "h_tile must be a multiple of 128 that divides 4*dim"
        else:
            chunk_budget = budget // 3
            th = Hp
            t = (min(Hp, 2048) // 128) * 128
            while t >= 128:
                if (Hp % t == 0 and
                        2 * (_pad2_bytes(D, t, mmb) + _pad2_bytes(t, D, mmb))
                        <= chunk_budget):
                    th = t
                    break
                t -= 128

        tm = pick_tm(lambda m: chunked_bytes(m, th),
                     row_tile if row_tile is not None else 768)
        grid = (_cdiv(rows, tm), Hp // th)
        est = chunked_bytes(tm, th)
        kernel = functools.partial(_chunked_kernel, eps=eps,
                                   approx_gelu=approx_gelu,
                                   cast_x=cast_x, acc_in_out=acc_in_out)
        scratch = []
        if not acc_in_out:
            scratch.append(pltpu.VMEM((tm, D), jnp.float32))
        if cast_x:
            scratch.append(pltpu.VMEM((tm, D), mm_dtype))
        grid_spec = pltpu.PrefetchScalarGridSpec(
            num_scalar_prefetch=0,
            grid=grid,
            in_specs=[
                pl.BlockSpec((tm, D), lambda i, j: (i, 0)),   # x rows (j-invariant)
                pl.BlockSpec((D, th), lambda i, j: (0, j)),   # W1 chunk
                pl.BlockSpec((1, th), lambda i, j: (0, j)),   # b1 chunk
                pl.BlockSpec((th, D), lambda i, j: (j, 0)),   # W2 chunk
                pl.BlockSpec((1, D), lambda i, j: (0, 0)),    # b2
                pl.BlockSpec((1, D), lambda i, j: (0, 0)),    # gamma
                pl.BlockSpec((1, D), lambda i, j: (0, 0)),    # beta
            ],
            out_specs=pl.BlockSpec((tm, D), lambda i, j: (i, 0)),
            scratch_shapes=scratch,
        )
        dims = ("parallel", "arbitrary")

    # VMEM limit: derived from the real estimate, clamped to device capacity.
    vmem_limit = int(min(vmem_cap * 0.92, max(est * 1.25, 32 * _MiB)))
    vmem_limit = max(vmem_limit, int(est) + 2 * _MiB)
    vmem_limit = int(min(vmem_limit, vmem_cap * 0.95))

    out2 = pl.pallas_call(
        kernel,
        out_shape=jax.ShapeDtypeStruct((rows, D), out_dtype),
        grid_spec=grid_spec,
        compiler_params=pltpu.CompilerParams(
            dimension_semantics=dims,
            vmem_limit_bytes=vmem_limit),
    )(x2, w1c, b1_2, w2c, b2_2, g_2, be_2)

    return out2.reshape(B, S, D)


# --------------------------------------------------------------------------
# Pure-JAX reference (mirrors the PyTorch module at eval time).
# --------------------------------------------------------------------------
def _reference(x, w1, b1, w2, b2, gamma, beta, eps=1e-12):
    h = x @ w1 + b1
    h = h * 0.5 * (1.0 + lax.erf(h * _INV_SQRT2))
    y = h @ w2 + b2
    z = y + x
    u = jnp.mean(z, axis=-1, keepdims=True)
    s = jnp.mean((z - u) ** 2, axis=-1, keepdims=True)
    return gamma * ((z - u) / jnp.sqrt(s + eps)) + beta


if __name__ == "__main__":
    # opt = {'dim': 32, 'dropout': 0.1}; dropout is identity at inference.
    B, S, D = 2, 8, 32
    H = 4 * D

    key = jax.random.PRNGKey(0)
    kx, k1, k2, k3, k4 = jax.random.split(key, 5)

    x = jax.random.normal(kx, (B, S, D), dtype=jnp.float32)
    lim1 = 1.0 / math.sqrt(D)
    lim2 = 1.0 / math.sqrt(H)
    w1 = jax.random.uniform(k1, (D, H), jnp.float32, -lim1, lim1)
    b1 = jax.random.uniform(k2, (H,), jnp.float32, -lim1, lim1)
    w2 = jax.random.uniform(k3, (H, D), jnp.float32, -lim2, lim2)
    b2 = jax.random.uniform(k4, (D,), jnp.float32, -lim2, lim2)
    gamma = jnp.ones((D,), jnp.float32)
    beta = jnp.zeros((D,), jnp.float32)

    ref = _reference(x, w1, b1, w2, b2, gamma, beta)

    # 1) Weight-resident path, f32 matmuls (verification path).
    out = jax.block_until_ready(
        intermediate_forward(x, w1, b1, w2, b2, gamma, beta,
                             matmul_dtype=jnp.float32))
    assert out.shape == (B, S, D)
    assert jnp.allclose(out, ref, atol=1e-4, rtol=1e-4), "f32 resident mismatch"

    # 2) Default bf16-matmul path (MXU-native); loose tolerance.
    out_bf16 = jax.block_until_ready(
        intermediate_forward(x, w1, b1, w2, b2, gamma, beta))
    assert jnp.allclose(out_bf16, ref, atol=1e-1, rtol=1e-1), "bf16 resident mismatch"

    # 3) Ragged row count -> partial boundary row tile (no full-tensor pad copy).
    S2 = 9
    x_r = jax.random.normal(jax.random.PRNGKey(1), (B, S2, D), dtype=jnp.float32)
    ref_r = _reference(x_r, w1, b1, w2, b2, gamma, beta)
    out_r = jax.block_until_ready(
        intermediate_forward(x_r, w1, b1, w2, b2, gamma, beta,
                             matmul_dtype=jnp.float32, row_tile=8))
    assert jnp.allclose(out_r, ref_r, atol=1e-4, rtol=1e-4), "ragged-rows mismatch"

    # 4) Chunked (streamed-weight) path: D=128, H=512, 4 reduction chunks.
    D2, H2 = 128, 512
    kk = jax.random.split(jax.random.PRNGKey(2), 5)
    lim1c = 1.0 / math.sqrt(D2)
    lim2c = 1.0 / math.sqrt(H2)
    x_c = jax.random.normal(kk[0], (B, S, D2), dtype=jnp.float32)
    w1_c = jax.random.uniform(kk[1], (D2, H2), jnp.float32, -lim1c, lim1c)
    b1_c = jax.random.uniform(kk[2], (H2,), jnp.float32, -lim1c, lim1c)
    w2_c = jax.random.uniform(kk[3], (H2, D2), jnp.float32, -lim2c, lim2c)
    b2_c = jax.random.uniform(kk[4], (D2,), jnp.float32, -lim2c, lim2c)
    g_c = jnp.ones((D2,), jnp.float32)
    be_c = jnp.zeros((D2,), jnp.float32)
    ref_c = _reference(x_c, w1_c, b1_c, w2_c, b2_c, g_c, be_c)

    out_c_f32 = jax.block_until_ready(
        intermediate_forward(x_c, w1_c, b1_c, w2_c, b2_c, g_c, be_c,
                             matmul_dtype=jnp.float32, h_tile=128))
    assert jnp.allclose(out_c_f32, ref_c, atol=1e-4, rtol=1e-4), "chunked f32 mismatch"

    out_c_bf16 = jax.block_until_ready(
        intermediate_forward(x_c, w1_c, b1_c, w2_c, b2_c, g_c, be_c, h_tile=128))
    assert jnp.allclose(out_c_bf16, ref_c, atol=1e-1, rtol=1e-1), "chunked bf16 mismatch"

    print("KERNEL_OK")
</pallas_src>

<mosaic_0001>
module attributes {stable_mosaic.version = 11 : i64} {
  func.func @_resident_kernel(%arg0: i32, %arg1: memref<16x32xf32, #tpu.memory_space<vmem>>, %arg2: memref<32x128xf32, #tpu.memory_space<vmem>>, %arg3: memref<1x128xf32, #tpu.memory_space<vmem>>, %arg4: memref<128x32xf32, #tpu.memory_space<vmem>>, %arg5: memref<1x32xf32, #tpu.memory_space<vmem>>, %arg6: memref<1x32xf32, #tpu.memory_space<vmem>>, %arg7: memref<1x32xf32, #tpu.memory_space<vmem>>, %arg8: memref<16x32xf32, #tpu.memory_space<vmem>>) attributes {dimension_semantics = [#tpu.dimension_semantics<parallel>], iteration_bounds = array<i64: 1>, scalar_prefetch = 0 : i64, scratch_operands = 0 : i64, tpu.core_type = #tpu.core_type<tc>, window_params = [{transform_indices = @transform_0, window_bounds = array<i64: 16, 32>}, {pipeline_mode = #tpu.pipeline_mode<synchronous>, transform_indices = @transform_1, window_bounds = array<i64: 32, 128>}, {pipeline_mode = #tpu.pipeline_mode<synchronous>, transform_indices = @transform_2, window_bounds = array<i64: 1, 128>}, {pipeline_mode = #tpu.pipeline_mode<synchronous>, transform_indices = @transform_3, window_bounds = array<i64: 128, 32>}, {pipeline_mode = #tpu.pipeline_mode<synchronous>, transform_indices = @transform_4, window_bounds = array<i64: 1, 32>}, {pipeline_mode = #tpu.pipeline_mode<synchronous>, transform_indices = @transform_5, window_bounds = array<i64: 1, 32>}, {pipeline_mode = #tpu.pipeline_mode<synchronous>, transform_indices = @transform_6, window_bounds = array<i64: 1, 32>}, {transform_indices = @transform_7, window_bounds = array<i64: 16, 32>}]} {
    %c0 = arith.constant 0 : index
    %c0_0 = arith.constant 0 : index
    %0 = vector.load %arg1[%c0, %c0_0] : memref<16x32xf32, #tpu.memory_space<vmem>>, vector<16x32xf32>
    %c0_1 = arith.constant 0 : index
    %c0_2 = arith.constant 0 : index
    %1 = vector.load %arg2[%c0_1, %c0_2] : memref<32x128xf32, #tpu.memory_space<vmem>>, vector<32x128xf32>
    %cst = arith.constant dense<0.000000e+00> : vector<16x128xf32>
    %2 = tpu.matmul %0, %1, %cst {dimension_numbers = #tpu.dot_dimension_numbers<[1], [0], [0], [1], [0, 0, 1, 1], [], []>} : vector<16x32xf32>, vector<32x128xf32>, vector<16x128xf32> -> vector<16x128xf32>
    %c0_3 = arith.constant 0 : index
    %c0_4 = arith.constant 0 : index
    %3 = vector.load %arg3[%c0_3, %c0_4] : memref<1x128xf32, #tpu.memory_space<vmem>>, vector<1x128xf32>
    %4 = vector.broadcast %3 : vector<1x128xf32> to vector<16x128xf32>
    %5 = arith.addf %2, %4 : vector<16x128xf32>
    %cst_5 = arith.constant 5.000000e-01 : f32
    %6 = vector.broadcast %cst_5 : f32 to vector<16x128xf32>
    %7 = arith.mulf %5, %6 : vector<16x128xf32>
    %cst_6 = arith.constant 0.707106769 : f32
    %8 = vector.broadcast %cst_6 : f32 to vector<16x128xf32>
    %9 = arith.mulf %5, %8 : vector<16x128xf32>
    %10 = math.erf %9 : vector<16x128xf32>
    %cst_7 = arith.constant 1.000000e+00 : f32
    %11 = vector.broadcast %cst_7 : f32 to vector<16x128xf32>
    %12 = arith.addf %11, %10 : vector<16x128xf32>
    %13 = arith.mulf %7, %12 : vector<16x128xf32>
    %c0_8 = arith.constant 0 : index
    %c0_9 = arith.constant 0 : index
    %14 = vector.load %arg4[%c0_8, %c0_9] : memref<128x32xf32, #tpu.memory_space<vmem>>, vector<128x32xf32>
    %cst_10 = arith.constant dense<0.000000e+00> : vector<16x32xf32>
    %15 = tpu.matmul %13, %14, %cst_10 {dimension_numbers = #tpu.dot_dimension_numbers<[1], [0], [0], [1], [0, 0, 1, 1], [], []>} : vector<16x128xf32>, vector<128x32xf32>, vector<16x32xf32> -> vector<16x32xf32>
    %c0_11 = arith.constant 0 : index
    %c0_12 = arith.constant 0 : index
    %16 = vector.load %arg5[%c0_11, %c0_12] : memref<1x32xf32, #tpu.memory_space<vmem>>, vector<1x32xf32>
    %17 = vector.broadcast %16 : vector<1x32xf32> to vector<16x32xf32>
    %18 = arith.addf %15, %17 : vector<16x32xf32>
    %19 = arith.addf %18, %0 : vector<16x32xf32>
    %c0_13 = arith.constant 0 : index
    %c0_14 = arith.constant 0 : index
    %20 = vector.load %arg6[%c0_13, %c0_14] : memref<1x32xf32, #tpu.memory_space<vmem>>, vector<1x32xf32>
    %c0_15 = arith.constant 0 : index
    %c0_16 = arith.constant 0 : index
    %21 = vector.load %arg7[%c0_15, %c0_16] : memref<1x32xf32, #tpu.memory_space<vmem>>, vector<1x32xf32>
    %cst_17 = arith.constant dense<0.000000e+00> : vector<16xf32>
    %22 = vector.multi_reduction <add>, %19, %cst_17 [1] : vector<16x32xf32> to vector<16xf32>
    %23 = vector.shape_cast %22 : vector<16xf32> to vector<16x1xf32>
    %cst_18 = arith.constant 3.200000e+01 : f32
    %24 = vector.broadcast %cst_18 : f32 to vector<16x1xf32>
    %25 = arith.divf %23, %24 : vector<16x1xf32>
    %26 = vector.broadcast %25 : vector<16x1xf32> to vector<16x32xf32>
    %27 = arith.subf %19, %26 : vector<16x32xf32>
    %28 = arith.mulf %27, %27 : vector<16x32xf32>
    %cst_19 = arith.constant dense<0.000000e+00> : vector<16xf32>
    %29 = vector.multi_reduction <add>, %28, %cst_19 [1] : vector<16x32xf32> to vector<16xf32>
    %30 = vector.shape_cast %29 : vector<16xf32> to vector<16x1xf32>
    %cst_20 = arith.constant 3.200000e+01 : f32
    %31 = vector.broadcast %cst_20 : f32 to vector<16x1xf32>
    %32 = arith.divf %30, %31 : vector<16x1xf32>
    %cst_21 = arith.constant 9.99999996E-13 : f32
    %33 = vector.broadcast %cst_21 : f32 to vector<16x1xf32>
    %34 = arith.addf %32, %33 : vector<16x1xf32>
    %35 = math.rsqrt %34 : vector<16x1xf32>
    %36 = vector.broadcast %35 : vector<16x1xf32> to vector<16x32xf32>
    %37 = arith.mulf %27, %36 : vector<16x32xf32>
    %38 = vector.broadcast %20 : vector<1x32xf32> to vector<16x32xf32>
    %39 = arith.mulf %38, %37 : vector<16x32xf32>
    %40 = vector.broadcast %21 : vector<1x32xf32> to vector<16x32xf32>
    %41 = arith.addf %39, %40 : vector<16x32xf32>
    %c0_22 = arith.constant 0 : index
    %c0_23 = arith.constant 0 : index
    %42 = vector.load %arg8[%c0_22, %c0_23] : memref<16x32xf32, #tpu.memory_space<vmem>>, vector<16x32xf32>
    tpu.vector_store %arg8[%c0_22, %c0_23], %41 {strides = array<i32>} : memref<16x32xf32, #tpu.memory_space<vmem>>, vector<16x32xf32>,
    return
  }
  func.func @transform_0(%arg0: i32) -> (i32, i32) {
    %c0_i32 = arith.constant 0 : i32
    %c0_i32_0 = arith.constant 0 : i32
    return %arg0, %c0_i32 : i32, i32
  }
  func.func @transform_1(%arg0: i32) -> (i32, i32) {
    %c0_i32 = arith.constant 0 : i32
    %c0_i32_0 = arith.constant 0 : i32
    %c0_i32_1 = arith.constant 0 : i32
    return %c0_i32, %c0_i32_0 : i32, i32
  }
  func.func @transform_2(%arg0: i32) -> (i32, i32) {
    %c0_i32 = arith.constant 0 : i32
    %c0_i32_0 = arith.constant 0 : i32
    %c0_i32_1 = arith.constant 0 : i32
    return %c0_i32, %c0_i32_0 : i32, i32
  }
  func.func @transform_3(%arg0: i32) -> (i32, i32) {
    %c0_i32 = arith.constant 0 : i32
    %c0_i32_0 = arith.constant 0 : i32
    %c0_i32_1 = arith.constant 0 : i32
    return %c0_i32, %c0_i32_0 : i32, i32
  }
  func.func @transform_4(%arg0: i32) -> (i32, i32) {
    %c0_i32 = arith.constant 0 : i32
    %c0_i32_0 = arith.constant 0 : i32
    %c0_i32_1 = arith.constant 0 : i32
    return %c0_i32, %c0_i32_0 : i32, i32
  }
  func.func @transform_5(%arg0: i32) -> (i32, i32) {
    %c0_i32 = arith.constant 0 : i32
    %c0_i32_0 = arith.constant 0 : i32
    %c0_i32_1 = arith.constant 0 : i32
    return %c0_i32, %c0_i32_0 : i32, i32
  }
  func.func @transform_6(%arg0: i32) -> (i32, i32) {
    %c0_i32 = arith.constant 0 : i32
    %c0_i32_0 = arith.constant 0 : i32
    %c0_i32_1 = arith.constant 0 : i32
    return %c0_i32, %c0_i32_0 : i32, i32
  }
  func.func @transform_7(%arg0: i32) -> (i32, i32) {
    %c0_i32 = arith.constant 0 : i32
    %c0_i32_0 = arith.constant 0 : i32
    return %arg0, %c0_i32 : i32, i32
  }
}

</mosaic_0001>

<bundles_post_ra>
// kernel: tpu_custom_call.1
= control target key start
LH: loop header
LB: loop body
LE: loop exit
PB: predicated region body
PF: predicated region fallthrough
CT: control target
= control target key end

     0   :  { %vm40_vm0 = vcmask 261120   ;;  %s591_s0 = inlined_call_operand.vmem [shape: f32[16,32], index: 0, kind: input, shape index: {}]   ;;  %s592_s1 = inlined_call_operand.vmem [shape: f32[32,128], index: 1, kind: input, shape index: {}]   ;;  %s593_s2 = inlined_call_operand.vmem [shape: f32[1,128], index: 2, kind: input, shape index: {}]   ;;  %s594_s3 = inlined_call_operand.vmem [shape: f32[128,32], index: 3, kind: input, shape index: {}]   ;;  %s595_s4 = inlined_call_operand.vmem [shape: f32[1,32], index: 4, kind: input, shape index: {}]   ;;  %s596_s5 = inlined_call_operand.vmem [shape: f32[1,32], index: 5, kind: input, shape index: {}]   ;;  %s597_s6 = inlined_call_operand.vmem [shape: f32[1,32], index: 6, kind: input, shape index: {}]   ;;  %s598_s7 = inlined_call_operand.hbm [shape: f32[16,32], index: 7, kind: output, shape index: {}]  }
   0x1   :  { %v29_v0 = vld [vmem:[%s592_s1] sm:$0xff]  ;;  %v30_v1 = vld [vmem:[%s592_s1 + $0x8] sm:$0xff]  ;;  %v31_v2 = vld [vmem:[%s592_s1 + $0x10] sm:$0xff] }
   0x2   :  { %v371_v3 = vpack.c.bf16 %v30_v1, %v29_v0  ;;  %v32_v4 = vld [vmem:[%s592_s1 + $0x18] sm:$0xff]  ;;  %v504_v5 = vld [vmem:[%s591_s0] sm:$0xff]  ;;  %v133_v8 = vld [vmem:[%s594_s3 + $0x8] sm:$0xff] }
   0x3   :  { %v375_v6 = vpack.c.bf16 %v32_v4, %v31_v2  ;;  %333 = vmatprep.mubr.msk.f32.mxu0 %vm40_vm0, %v504_v5  ;;  %v132_v7 = vld [vmem:[%s594_s3] sm:$0xff]  ;;  %v134_v9 = vld [vmem:[%s594_s3 + $0x10] sm:$0xff]  ;;  %v135_v11 = vld [vmem:[%s594_s3 + $0x18] sm:$0xff] }
   0x4   :  { %372 = vmatprep.subr.bf16.mxu0 %v371_v3  ;;  %v379_v10 = vpack.c.bf16 %v133_v8, %v132_v7  ;;  %v383_v12 = vpack.c.bf16 %v135_v11, %v134_v9  ;;  %v136_v13 = vld [vmem:[%s594_s3 + $0x20] sm:$0xff]  ;;  %v137_v14 = vld [vmem:[%s594_s3 + $0x28] sm:$0xff] }
   0x5   :  { %374 = vmatpush3.bf16.msra.mxu0 %v371_v3 }
   0x6   :  { %12 = vsyncpa [#allocation3], 0  ;;  %376 = vmatprep.subr.bf16.mxu0 %v375_v6  ;;  %380 = vmatprep.subr.bf16.mxu1 %v379_v10  ;;  %v387_v15 = vpack.c.bf16 %v137_v14, %v136_v13  ;;  %v28_v16 = vld [vmem:[%s591_s0 + $0x8] sm:$0xff]  ;;  %v138_v17 = vld [vmem:[%s594_s3 + $0x30] sm:$0xff]  ;;  %s446_s24 = smov [#allocation2]  }
   0x7   :  { %382 = vmatpush3.bf16.msra.mxu1 %v379_v10  ;;  %v139_v18 = vld [vmem:[%s594_s3 + $0x38] sm:$0xff]  ;;  %v140_v20 = vld [vmem:[%s594_s3 + $0x40] sm:$0xff]  ;;  %v141_v21 = vld [vmem:[%s594_s3 + $0x48] sm:$0xff]  ;;  %s284_s25 = sshll.u32 %s446_s24, 4  ;;  %s285_s25 = int_to_ptr.vmem [resolvable:$true] %s284_s25 }
   0x8   :  { %384 = vmatprep.subr.bf16.mxu1 %v383_v12  ;;  %v391_v19 = vpack.c.bf16 %v139_v18, %v138_v17  ;;  %v395_v22 = vpack.c.bf16 %v141_v21, %v140_v20  ;;  %v142_v23 = vld [vmem:[%s594_s3 + $0x50] sm:$0xff]  ;;  %v143_v24 = vld [vmem:[%s594_s3 + $0x58] sm:$0xff]  ;;  %v144_v26 = vld [vmem:[%s594_s3 + $0x60] sm:$0xff]  ;;  %s422_s26 = scalar_lea.vmem %s285_s25, 256  ;;  %p427_p1 = scmp.lt.s32.totalorder %s285_s25, %s285_s25 }
   0x9   :  { %378 = vmatpush3.bf16.msra.mxu0 %v375_v6  ;;  %v399_v25 = vpack.c.bf16 %v143_v24, %v142_v23  ;;  %v145_v27 = vld [vmem:[%s594_s3 + $0x68] sm:$0xff]  ;;  %v146_v29 = vld [vmem:[%s594_s3 + $0x70] sm:$0xff]  ;;  %v147_v30 = vld [vmem:[%s594_s3 + $0x78] sm:$0xff]  ;;  %p423_p0 = scmp.ne.s32.totalorder %s285_s25, %s422_s26  ;;  %p428_p2 = scmp.lt.s32.totalorder %s422_s26, %s422_s26 }
   0xa   :  { %v403_v28 = vpack.c.bf16 %v145_v27, %v144_v26  ;;  %v407_v31 = vpack.c.bf16 %v147_v30, %v146_v29  ;;  %v295_v32 = vld [vmem:[%s593_s2] ss:$0 sm:$0xff] }
   0xb   :  { %386 = vmatpush3.bf16.msra.mxu1 %v383_v12  ;;  %v298_v47 = vld [vmem:[%s595_s4] ss:$0 sm:$0xff]  ;;  %p429_p3 = por %p428_p2, %p427_p1 }
   0xc   :  { %334 = vmatmul.mubr.msk.f32.vlgmr.msra.gmra.mrb[0].mxu0 %vm40_vm0, %v28_v16  ;;  %388 = vmatprep.subr.bf16.mxu1 %v387_v15  ;;  %v299_v9 = vld [vmem:[%s596_s5] ss:$0 sm:$0xff] }
   0xd   :  { %v300_v11 = vld [vmem:[%s597_s6] ss:$0 sm:$0xff]  ;;  %p430_p4 = pnand %p429_p3, %p423_p0 }
   0xf   :  { %390 = vmatpush3.bf16.msra.mxu1 %v387_v15 }
  0x10   :  { %392 = vmatprep.subr.bf16.mxu1 %v391_v19 }
  0x13   :  { %394 = vmatpush3.bf16.msra.mxu1 %v391_v19 }
  0x14   :  { %396 = vmatprep.subr.bf16.mxu1 %v395_v22 }
  0x17   :  { %398 = vmatpush3.bf16.msra.mxu1 %v395_v22 }
  0x18   :  { %400 = vmatprep.subr.bf16.mxu1 %v399_v25 }
  0x1b   :  { %402 = vmatpush3.bf16.msra.mxu1 %v399_v25 }
  0x1c   :  { %404 = vmatprep.subr.bf16.mxu1 %v403_v28 }
  0x1f   :  { %406 = vmatpush3.bf16.msra.mxu1 %v403_v28 }
  0x20   :  { %408 = vmatprep.subr.bf16.mxu1 %v407_v31 }
  0x23   :  { %410 = vmatpush3.bf16.msra.mxu1 %v407_v31 }
  0xdf   :  { %v335_v33 = vpop.f32.mrb[0].mxu0 }
  0xe0   :  { %v119_v34 = vadd.f32 %v335_v33, %v295_v32  ;;  %v113_v35 = vpop.f32.mrb[1].mxu0 }
  0xe1   :  { %v114_v36 = vadd.f32 %v295_v32, %v113_v35 }
  0xe2   :  { %v125_v37 = vmul.f32 0.70710677, %v119_v34  ;;  %v123_v44 = vmul.f32 0.5, %v119_v34 }
  0xe3   :  { %v124_v38 = vmul.f32 0.70710677, %v114_v36  ;;  %v122_v42 = vmul.f32 0.5, %v114_v36 }
  0xe4   :  { %414 = verf.f32 %v125_v37 }
  0xe5   :  { %416 = verf.f32 %v124_v38 }
  0xee   :  { %v415_v39 = vpop.eup %414 }
  0xef   :  { %v417_v40 = vpop.eup %416  ;;  %v129_v41 = vadd.f32 1.0, %v415_v39 }
  0xf0   :  { %v128_v43 = vadd.f32 1.0, %v417_v40 }
  0xf1   :  { %v131_v46 = vmul.f32 %v129_v41, %v123_v44 }
  0xf2   :  { %v130_v45 = vmul.f32 %v128_v43, %v122_v42 }
  0xf4   :  { %368 = vmatprep.mubr.f32.mxu1 %v130_v45 }
  0xf5   :  { %369 = vmatmul.mubr.f32.vlgmr.msra.gmra.mrb[0].mxu1 %v131_v46 }
 0x1c8   :  { %v370_v48 = vpop.f32.mrb[0].mxu1 }
 0x1c9   :  { %v221_v49 = vpop.f32.mrb[1].mxu1  ;;  %v227_v50 = vadd.f32 %v370_v48, %v298_v47 }
 0x1ca   :  { %v222_v51 = vadd.f32 %v298_v47, %v221_v49 }
 0x1cb   :  { %v231_v54 = vadd.f32 %v227_v50, %v28_v16 }
 0x1cc   :  { %v230_v52 = vadd.f32 %v222_v51, %v504_v5 }
 0x1cd   :  { %v237_v55 = vsel %vm40_vm0, %v231_v54, 0.0 }
 0x1ce   :  { %v234_v53 = vsel %vm40_vm0, %v230_v52, 0.0 }
 0x1cf   :  { %235 = vadd.xlane.f32.xlu0 %v234_v53 }
 0x1d3   :  { %238 = vadd.xlane.f32.xlu0 %v237_v55 }
 0x25c   :  { %v236_v56 = vpop.xlane.xlu0 %235 }
 0x25d   :  { %v241_v57 = vmul.f32 0.03125, %v236_v56 }
 0x25f   :  { %v243_v58 = vsub.f32 %v230_v52, %v241_v57 }
 0x260   :  { %v239_v59 = vpop.xlane.xlu0 %238 }
 0x261   :  { %v242_v60 = vmul.f32 0.03125, %v239_v59  ;;  %v245_v61 = vmul.f32 %v243_v58, %v243_v58 }
 0x263   :  { %v244_v62 = vsub.f32 %v231_v54, %v242_v60  ;;  %v247_v63 = vsel %vm40_vm0, %v245_v61, 0.0 }
 0x264   :  { %248 = vadd.xlane.f32.xlu1 %v247_v63 }
 0x265   :  { %v246_v0 = vmul.f32 %v244_v62, %v244_v62 }
 0x267   :  { %v250_v1 = vsel %vm40_vm0, %v246_v0, 0.0 }
 0x268   :  { %251 = vadd.xlane.f32.xlu1 %v250_v1 }
 0x2f1   :  { %v249_v2 = vpop.xlane.xlu1 %248 }
 0x2f2   :  { %v253_v3 = vmul.f32 0.03125, %v249_v2 }
 0x2f4   :  { %v255_v4 = vadd.f32 1e-12, %v253_v3 }
 0x2f5   :  { %v252_v5 = vpop.xlane.xlu1 %251 }
 0x2f6   :  { %418 = vrsqrt.f32 %v255_v4  ;;  %v254_v6 = vmul.f32 0.03125, %v252_v5 }
 0x2f8   :  { %v256_v7 = vadd.f32 1e-12, %v254_v6 }
 0x2fa   :  { %420 = vrsqrt.f32 %v256_v7 }
 0x300   :  { %v419_v8 = vpop.eup %418 }
 0x301   :  { %v259_v10 = vmul.f32 %v419_v8, %v243_v58 }
 0x303   :  { %v267_v12 = vmul.f32 %v299_v9, %v259_v10 }
 0x304   :  { %v421_v13 = vpop.eup %420 }
 0x305   :  { %v260_v14 = vmul.f32 %v421_v13, %v244_v62  ;;  %v275_v15 = vadd.f32 %v300_v11, %v267_v12 }
 0x307   :  { %v268_v16 = vmul.f32 %v299_v9, %v260_v14  ;;  %277 = vst.msk [vmem:[#allocation2] sm:$0xff] %vm40_vm0, %v275_v15 }
 0x309   :  { %v276_v17 = vadd.f32 %v300_v11, %v268_v16 }
 0x30b   :  { %278 = vst.msk [vmem:[#allocation2 + $0x8] sm:$0xff] %vm40_vm0, %v276_v17 }
 0x30c   :  { %433 = shalt.err (!%p430_p4)
}
 0x30d   :  { %s434_s27 = scalar_lea.hbm %s598_s7, 256 }
 0x30e   :  { %p435_p5 = scmp.ne.s32.totalorder %s598_s7, %s434_s27  ;;  %p438_p6 = scmp.lt.u32.totalorder %s434_s27, %s598_s7 }
 0x310   :  { %p440_p7 = pnand %p438_p6, %p435_p5 }
 0x312   :  { %443 = shalt.err (!%p440_p7)
}
 0x313   :  { %s447_s8 = smov 128   ;;  %s448_s9 = smov 8  }
 0x314   :  { %290 = dma.vmem_to_hbm [thread:$0]  %s285_s25, 256, %s598_s7, [#allocation3], %s447_s8, %s447_s8, %s448_s9  }
 0x315   :  { %444 = dma.done.wait [#allocation3], 256  }
 0x316   :  { %445 = vsyncadd [#allocation3], 4294967040 }
 0x317   :  { %294 = vsyncpa [#allocation3], 1 }

</bundles_post_ra>
